<compile_context>
chip_gen: v6e
topology: v6e:2x2x1
jax: 0.10.0
libtpu: 0.0.40
codegen_flags: <defaults>
</compile_context>

<pallas_src>
import jax
import jax.numpy as jnp
from jax.experimental import pallas as pl
from jax.experimental.pallas import tpu as pltpu

LANE = 128
TN_CAP = 2048          # point-axis tile width cap (multiple of 128)
MAX_STEP_POINTS = 4096 # cap on BB*TN when folding batches into one grid step
MAX_BB = 8             # cap on static unroll over batches inside the kernel


def _round_up(a, m):
    return ((a + m - 1) // m) * m


# ----------------------------------------------------------------------------- kernel
def _make_fold_kernel(H, H2, BB):
    """Kernel closure over static channel sizes and the batch-block size BB."""

    def kernel(seed_ref, c_ref, w1_ref, w2_ref, w34_ref, w5_ref, w6_ref, k_ref,
               out_ref):
        # seed tile (2, TN); split into the two sublane rows once.
        seed = seed_ref[...]
        sa = seed[0:1, :]                    # (1, TN)
        sb = seed[1:2, :]                    # (1, TN)

        # Weights (BN scales already folded in wrapper-side).
        w1 = w1_ref[...]                     # (H, 2)
        w1a = w1[:, 0:1]                     # (H, 1)
        w1b = w1[:, 1:2]                     # (H, 1)
        w2 = w2_ref[...]                     # (H2, H)
        w34 = w34_ref[...]                   # (H, H2)
        w5 = w5_ref[...]                     # (H2, H)
        w6 = w6_ref[...]                     # (3, H2)

        # Stacked constant bias columns: [bb2 | bb5 | b6].
        k = k_ref[...]                       # (2*H2 + 3, 1)
        bb2 = k[0:H2, :]
        bb5 = k[H2:2 * H2, :]
        b6 = k[2 * H2:2 * H2 + 3, :]

        # Static unroll over the BB batches handled by this grid step.
        for i in range(BB):
            c = c_ref[i]                     # (2H, 1) packed per-batch bias columns
            c1 = c[0:H, :]
            c4 = c[H:2 * H, :]

            # folding1 layer 1: K=2 contraction as two VPU rank-1 updates + ReLU.
            h = jnp.maximum(w1a * sa + w1b * sb + c1, 0.0)                       # (H, TN)
            # folding1 layer 2: conv1x1 (BN folded) + ReLU
            h = jnp.maximum(
                jnp.dot(w2, h, preferred_element_type=jnp.float32) + bb2, 0.0)   # (H2, TN)
            # fused folding1-conv3 + folding2-conv1 (BN folded) + ReLU
            g = jnp.maximum(
                jnp.dot(w34, h, preferred_element_type=jnp.float32) + c4, 0.0)   # (H, TN)
            # folding2 layer 2: conv1x1 (BN folded) + ReLU
            g = jnp.maximum(
                jnp.dot(w5, g, preferred_element_type=jnp.float32) + bb5, 0.0)   # (H2, TN)
            # folding2 layer 3: conv1x1 + bias -> lane-dense (3, TN) output block
            out_ref[i] = jnp.dot(w6, g, preferred_element_type=jnp.float32) + b6

    return kernel


# ----------------------------------------------------------------------------- params
def make_params(key, in_channel, hidden_dim):
    """Deterministic synthetic parameters (conv weights stored as (C_in, C_out))."""
    h, h2 = hidden_dim, hidden_dim // 2
    dims1 = [(in_channel + 2, h), (h, h2), (h2, 3)]
    dims2 = [(in_channel + 3, h), (h, h2), (h2, 3)]
    keys = jax.random.split(key, 32)
    ki = iter(range(32))
    p = {}

    def conv(name, cin, cout):
        p[f"{name}_w"] = 0.2 * jax.random.normal(keys[next(ki)], (cin, cout), jnp.float32)
        p[f"{name}_b"] = 0.1 * jax.random.normal(keys[next(ki)], (cout,), jnp.float32)

    def bn(name, c):
        p[f"{name}_g"] = 1.0 + 0.1 * jax.random.normal(keys[next(ki)], (c,), jnp.float32)
        p[f"{name}_be"] = 0.05 * jax.random.normal(keys[next(ki)], (c,), jnp.float32)
        p[f"{name}_m"] = 0.1 * jax.random.normal(keys[next(ki)], (c,), jnp.float32)
        p[f"{name}_v"] = 0.5 + jnp.abs(0.2 * jax.random.normal(keys[next(ki)], (c,), jnp.float32))

    for i, (cin, cout) in enumerate(dims1):
        conv(f"f1_c{i}", cin, cout)
        if i < 2:
            bn(f"f1_bn{i}", cout)
    for i, (cin, cout) in enumerate(dims2):
        conv(f"f2_c{i}", cin, cout)
        if i < 2:
            bn(f"f2_bn{i}", cout)
    return p


def _fold_bn(conv_b, g, be, m, v, eps=1e-5):
    """Fold eval-mode BN into a per-channel (scale, shifted-bias) pair (1-D vectors)."""
    s = g / jnp.sqrt(v + eps)
    bb = conv_b * s + (be - m * s)
    return s, bb


# ----------------------------------------------------------------------------- wrapper
def fold_forward(x, params, step, in_channel, hidden_dim):
    """x: (bs, in_channel) float32.  Returns (bs, 3, step*step) like the PyTorch module."""
    bs = x.shape[0]
    N = step * step
    H, H2 = hidden_dim, hidden_dim // 2

    # Folding seed in channel-major (2, N) layout (same construction as torch buffer).
    lin = jnp.linspace(-1.0, 1.0, step, dtype=jnp.float32)
    a = jnp.tile(lin, step)          # (N,)
    b = jnp.repeat(lin, step)        # (N,)
    seed = jnp.stack([a, b], axis=0)                                   # (2, N)

    # ---- point-axis tiling ---------------------------------------------------
    N_pad = _round_up(N, LANE)
    TN = min(TN_CAP, N_pad)
    # v7x: single batch + single point tile with non-trivial work -> split the
    # point axis so both TensorCores get a grid step.
    if bs == 1 and N_pad <= TN and N_pad >= 4 * LANE:
        TN = _round_up(N_pad // 2, LANE)
    N_pad = _round_up(N_pad, TN)
    n_tiles = N_pad // TN
    if N_pad != N:
        seed = jnp.pad(seed, ((0, 0), (0, N_pad - N)))

    # ---- batch blocking for the tiny-N regime --------------------------------
    if n_tiles == 1:
        bb_cap = max(1, min(MAX_BB, MAX_STEP_POINTS // TN))
        BB = 1
        for d in range(1, bs + 1):
            if bs % d == 0 and d <= bb_cap:
                BB = d
    else:
        BB = 1

    # ---- fold BN + biases into weights / per-batch columns --------------------
    p = params
    s1, bb1 = _fold_bn(p["f1_c0_b"], p["f1_bn0_g"], p["f1_bn0_be"], p["f1_bn0_m"], p["f1_bn0_v"])
    s2, bb2 = _fold_bn(p["f1_c1_b"], p["f1_bn1_g"], p["f1_bn1_be"], p["f1_bn1_m"], p["f1_bn1_v"])
    s4, bb4 = _fold_bn(p["f2_c0_b"], p["f2_bn0_g"], p["f2_bn0_be"], p["f2_bn0_m"], p["f2_bn0_v"])
    s5, bb5 = _fold_bn(p["f2_c1_b"], p["f2_bn1_g"], p["f2_bn1_be"], p["f2_bn1_m"], p["f2_bn1_v"])
    b3 = p["f1_c2_b"]                                          # (3,)
    b6 = p["f2_c2_b"]                                          # (3,)

    W1, W2, W3 = p["f1_c0_w"], p["f1_c1_w"], p["f1_c2_w"]
    W4, W5, W6 = p["f2_c0_w"], p["f2_c1_w"], p["f2_c2_w"]
    W1a, W1b = W1[:2], W1[2:]                                  # seed / feature split
    W4a, W4b = W4[:3], W4[3:]                                  # fd1  / feature split

    # Exact algebraic fusion of conv3 -> conv4 (no nonlinearity in between).
    W34 = W3 @ W4a                                             # (H2, H)

    # Transposed weights with BN scale folded in (eval-mode BN, exact algebra).
    w1s = s1[:, None] * W1a.T                                  # (H, 2)
    w2s = s2[:, None] * W2.T                                   # (H2, H)
    w34s = s4[:, None] * W34.T                                 # (H, H2)
    w5s = s5[:, None] * W5.T                                   # (H2, H)
    w6t = W6.T                                                 # (3, H2)

    # Per-batch fused bias columns (feature contribution + conv bias + BN shift),
    # packed into a single (bs, 2H, 1) array.
    c1 = (x @ W1b) * s1[None, :] + bb1[None, :]                # (bs, H)
    c4 = (x @ W4b + b3 @ W4a) * s4[None, :] + bb4[None, :]     # (bs, H)
    c = jnp.concatenate([c1, c4], axis=1).reshape(bs, 2 * H, 1)

    # Stacked constant bias columns [bb2 | bb5 | b6].
    kvec = jnp.concatenate([bb2, bb5, b6]).reshape(-1, 1)      # (2*H2+3, 1)

    grid = (bs // BB, n_tiles)
    const = lambda r, cdim: pl.BlockSpec((r, cdim), lambda bi, j: (0, 0))

    out = pl.pallas_call(
        _make_fold_kernel(H, H2, BB),
        out_shape=jax.ShapeDtypeStruct((bs, 3, N_pad), jnp.float32),
        grid=grid,
        in_specs=[
            pl.BlockSpec((2, TN), lambda bi, j: (0, j)),                   # seed
            pl.BlockSpec((BB, 2 * H, 1), lambda bi, j: (bi, 0, 0)),        # packed per-batch columns
            const(H, 2),                                                   # w1 (scaled)
            const(H2, H),                                                  # w2 (scaled)
            const(H, H2),                                                  # w34 (scaled)
            const(H2, H),                                                  # w5 (scaled)
            const(3, H2),                                                  # w6
            const(2 * H2 + 3, 1),                                          # bb2|bb5|b6
        ],
        out_specs=pl.BlockSpec((BB, 3, TN), lambda bi, j: (bi, 0, j)),
        compiler_params=pltpu.CompilerParams(
            dimension_semantics=("parallel", "parallel")),
    )(seed, c, w1s, w2s, w34s, w5s, w6t, kvec)

    return out if N_pad == N else out[:, :, :N]


# ----------------------------------------------------------------------------- reference
def ref_forward(x, p, step, in_channel, eps=1e-5):
    bs = x.shape[0]
    N = step * step
    lin = jnp.linspace(-1.0, 1.0, step, dtype=jnp.float32)
    a = jnp.tile(lin, step)
    b = jnp.repeat(lin, step)
    seed = jnp.stack([a, b], axis=0)                                   # (2, N)
    feat = jnp.broadcast_to(x[:, :, None], (bs, in_channel, N))
    x0 = jnp.concatenate([jnp.broadcast_to(seed[None], (bs, 2, N)), feat], axis=1)

    def conv(z, w, bi):
        return jnp.einsum("bin,io->bon", z, w) + bi[None, :, None]

    def bn(z, g, be, m, v):
        return (z - m[None, :, None]) / jnp.sqrt(v[None, :, None] + eps) * g[None, :, None] \
               + be[None, :, None]

    h = jax.nn.relu(bn(conv(x0, p["f1_c0_w"], p["f1_c0_b"]),
                       p["f1_bn0_g"], p["f1_bn0_be"], p["f1_bn0_m"], p["f1_bn0_v"]))
    h = jax.nn.relu(bn(conv(h, p["f1_c1_w"], p["f1_c1_b"]),
                       p["f1_bn1_g"], p["f1_bn1_be"], p["f1_bn1_m"], p["f1_bn1_v"]))
    fd1 = conv(h, p["f1_c2_w"], p["f1_c2_b"])
    x1 = jnp.concatenate([fd1, feat], axis=1)
    g = jax.nn.relu(bn(conv(x1, p["f2_c0_w"], p["f2_c0_b"]),
                       p["f2_bn0_g"], p["f2_bn0_be"], p["f2_bn0_m"], p["f2_bn0_v"]))
    g = jax.nn.relu(bn(conv(g, p["f2_c1_w"], p["f2_c1_b"]),
                       p["f2_bn1_g"], p["f2_bn1_be"], p["f2_bn1_m"], p["f2_bn1_v"]))
    return conv(g, p["f2_c2_w"], p["f2_c2_b"])


# ----------------------------------------------------------------------------- main
if __name__ == "__main__":
    bs, in_channel, step, hidden_dim = 2, 4, 8, 64   # small shapes; hidden_dim//2 = 32

    key = jax.random.PRNGKey(0)
    kx, kp = jax.random.split(key)
    x = jax.random.normal(kx, (bs, in_channel), jnp.float32)
    params = make_params(kp, in_channel, hidden_dim)

    out = fold_forward(x, params, step, in_channel, hidden_dim)
    out = jax.block_until_ready(out)

    ref = ref_forward(x, params, step, in_channel)
    assert out.shape == (bs, 3, step * step), out.shape
    err = float(jnp.max(jnp.abs(out - ref)))
    assert jnp.allclose(out, ref, atol=2e-4, rtol=2e-4), err

    print("KERNEL_OK")
</pallas_src>

<mosaic_0001>
module attributes {stable_mosaic.version = 11 : i64} {
  func.func @kernel(%arg0: i32, %arg1: i32, %arg2: memref<2x128xf32, #tpu.memory_space<vmem>>, %arg3: memref<2x128x1xf32, #tpu.memory_space<vmem>>, %arg4: memref<64x2xf32, #tpu.memory_space<vmem>>, %arg5: memref<32x64xf32, #tpu.memory_space<vmem>>, %arg6: memref<64x32xf32, #tpu.memory_space<vmem>>, %arg7: memref<32x64xf32, #tpu.memory_space<vmem>>, %arg8: memref<3x32xf32, #tpu.memory_space<vmem>>, %arg9: memref<67x1xf32, #tpu.memory_space<vmem>>, %arg10: memref<2x3x128xf32, #tpu.memory_space<vmem>>) attributes {dimension_semantics = [#tpu.dimension_semantics<parallel>, #tpu.dimension_semantics<parallel>], iteration_bounds = array<i64: 1, 1>, scalar_prefetch = 0 : i64, scratch_operands = 0 : i64, tpu.core_type = #tpu.core_type<tc>, window_params = [{transform_indices = @transform_0, window_bounds = array<i64: 2, 128>}, {transform_indices = @transform_1, window_bounds = array<i64: 2, 128, 1>}, {pipeline_mode = #tpu.pipeline_mode<synchronous>, transform_indices = @transform_2, window_bounds = array<i64: 64, 2>}, {pipeline_mode = #tpu.pipeline_mode<synchronous>, transform_indices = @transform_3, window_bounds = array<i64: 32, 64>}, {pipeline_mode = #tpu.pipeline_mode<synchronous>, transform_indices = @transform_4, window_bounds = array<i64: 64, 32>}, {pipeline_mode = #tpu.pipeline_mode<synchronous>, transform_indices = @transform_5, window_bounds = array<i64: 32, 64>}, {pipeline_mode = #tpu.pipeline_mode<synchronous>, transform_indices = @transform_6, window_bounds = array<i64: 3, 32>}, {pipeline_mode = #tpu.pipeline_mode<synchronous>, transform_indices = @transform_7, window_bounds = array<i64: 67, 1>}, {transform_indices = @transform_8, window_bounds = array<i64: 2, 3, 128>}]} {
    %c0 = arith.constant 0 : index
    %c0_0 = arith.constant 0 : index
    %0 = vector.load %arg2[%c0, %c0_0] : memref<2x128xf32, #tpu.memory_space<vmem>>, vector<2x128xf32>
    %1 = vector.extract_strided_slice %0 {offsets = [0, 0], sizes = [1, 128], strides = [1, 1]} : vector<2x128xf32> to vector<1x128xf32>
    %2 = vector.extract_strided_slice %0 {offsets = [1, 0], sizes = [1, 128], strides = [1, 1]} : vector<2x128xf32> to vector<1x128xf32>
    %c0_1 = arith.constant 0 : index
    %c0_2 = arith.constant 0 : index
    %3 = vector.load %arg4[%c0_1, %c0_2] : memref<64x2xf32, #tpu.memory_space<vmem>>, vector<64x2xf32>
    %4 = vector.extract_strided_slice %3 {offsets = [0, 0], sizes = [64, 1], strides = [1, 1]} : vector<64x2xf32> to vector<64x1xf32>
    %5 = vector.extract_strided_slice %3 {offsets = [0, 1], sizes = [64, 1], strides = [1, 1]} : vector<64x2xf32> to vector<64x1xf32>
    %c0_3 = arith.constant 0 : index
    %c0_4 = arith.constant 0 : index
    %6 = vector.load %arg5[%c0_3, %c0_4] : memref<32x64xf32, #tpu.memory_space<vmem>>, vector<32x64xf32>
    %c0_5 = arith.constant 0 : index
    %c0_6 = arith.constant 0 : index
    %7 = vector.load %arg6[%c0_5, %c0_6] : memref<64x32xf32, #tpu.memory_space<vmem>>, vector<64x32xf32>
    %c0_7 = arith.constant 0 : index
    %c0_8 = arith.constant 0 : index
    %8 = vector.load %arg7[%c0_7, %c0_8] : memref<32x64xf32, #tpu.memory_space<vmem>>, vector<32x64xf32>
    %c0_9 = arith.constant 0 : index
    %c0_10 = arith.constant 0 : index
    %9 = vector.load %arg8[%c0_9, %c0_10] : memref<3x32xf32, #tpu.memory_space<vmem>>, vector<3x32xf32>
    %c0_11 = arith.constant 0 : index
    %c0_12 = arith.constant 0 : index
    %10 = vector.load %arg9[%c0_11, %c0_12] : memref<67x1xf32, #tpu.memory_space<vmem>>, vector<67x1xf32>
    %11 = vector.extract_strided_slice %10 {offsets = [0, 0], sizes = [32, 1], strides = [1, 1]} : vector<67x1xf32> to vector<32x1xf32>
    %12 = vector.extract_strided_slice %10 {offsets = [32, 0], sizes = [32, 1], strides = [1, 1]} : vector<67x1xf32> to vector<32x1xf32>
    %13 = vector.extract_strided_slice %10 {offsets = [64, 0], sizes = [3, 1], strides = [1, 1]} : vector<67x1xf32> to vector<3x1xf32>
    %c0_13 = arith.constant 0 : index
    %c0_14 = arith.constant 0 : index
    %c0_15 = arith.constant 0 : index
    %14 = vector.load %arg3[%c0_13, %c0_14, %c0_15] : memref<2x128x1xf32, #tpu.memory_space<vmem>>, vector<1x128x1xf32>
    %15 = vector.shape_cast %14 : vector<1x128x1xf32> to vector<128x1xf32>
    %16 = vector.extract_strided_slice %15 {offsets = [0, 0], sizes = [64, 1], strides = [1, 1]} : vector<128x1xf32> to vector<64x1xf32>
    %17 = vector.extract_strided_slice %15 {offsets = [64, 0], sizes = [64, 1], strides = [1, 1]} : vector<128x1xf32> to vector<64x1xf32>
    %18 = vector.broadcast %4 : vector<64x1xf32> to vector<64x128xf32>
    %19 = vector.broadcast %1 : vector<1x128xf32> to vector<64x128xf32>
    %20 = arith.mulf %18, %19 : vector<64x128xf32>
    %21 = vector.broadcast %5 : vector<64x1xf32> to vector<64x128xf32>
    %22 = vector.broadcast %2 : vector<1x128xf32> to vector<64x128xf32>
    %23 = arith.mulf %21, %22 : vector<64x128xf32>
    %24 = arith.addf %20, %23 : vector<64x128xf32>
    %25 = vector.broadcast %16 : vector<64x1xf32> to vector<64x128xf32>
    %26 = arith.addf %24, %25 : vector<64x128xf32>
    %cst = arith.constant 0.000000e+00 : f32
    %27 = vector.broadcast %cst : f32 to vector<64x128xf32>
    %28 = arith.maximumf %26, %27 : vector<64x128xf32>
    %cst_16 = arith.constant dense<0.000000e+00> : vector<32x128xf32>
    %29 = tpu.matmul %6, %28, %cst_16 {dimension_numbers = #tpu.dot_dimension_numbers<[1], [0], [0], [1], [0, 0, 1, 1], [], []>} : vector<32x64xf32>, vector<64x128xf32>, vector<32x128xf32> -> vector<32x128xf32>
    %30 = vector.broadcast %11 : vector<32x1xf32> to vector<32x128xf32>
    %31 = arith.addf %29, %30 : vector<32x128xf32>
    %cst_17 = arith.constant 0.000000e+00 : f32
    %32 = vector.broadcast %cst_17 : f32 to vector<32x128xf32>
    %33 = arith.maximumf %31, %32 : vector<32x128xf32>
    %cst_18 = arith.constant dense<0.000000e+00> : vector<64x128xf32>
    %34 = tpu.matmul %7, %33, %cst_18 {dimension_numbers = #tpu.dot_dimension_numbers<[1], [0], [0], [1], [0, 0, 1, 1], [], []>} : vector<64x32xf32>, vector<32x128xf32>, vector<64x128xf32> -> vector<64x128xf32>
    %35 = vector.broadcast %17 : vector<64x1xf32> to vector<64x128xf32>
    %36 = arith.addf %34, %35 : vector<64x128xf32>
    %cst_19 = arith.constant 0.000000e+00 : f32
    %37 = vector.broadcast %cst_19 : f32 to vector<64x128xf32>
    %38 = arith.maximumf %36, %37 : vector<64x128xf32>
    %cst_20 = arith.constant dense<0.000000e+00> : vector<32x128xf32>
    %39 = tpu.matmul %8, %38, %cst_20 {dimension_numbers = #tpu.dot_dimension_numbers<[1], [0], [0], [1], [0, 0, 1, 1], [], []>} : vector<32x64xf32>, vector<64x128xf32>, vector<32x128xf32> -> vector<32x128xf32>
    %40 = vector.broadcast %12 : vector<32x1xf32> to vector<32x128xf32>
    %41 = arith.addf %39, %40 : vector<32x128xf32>
    %cst_21 = arith.constant 0.000000e+00 : f32
    %42 = vector.broadcast %cst_21 : f32 to vector<32x128xf32>
    %43 = arith.maximumf %41, %42 : vector<32x128xf32>
    %cst_22 = arith.constant dense<0.000000e+00> : vector<3x128xf32>
    %44 = tpu.matmul %9, %43, %cst_22 {dimension_numbers = #tpu.dot_dimension_numbers<[1], [0], [0], [1], [0, 0, 1, 1], [], []>} : vector<3x32xf32>, vector<32x128xf32>, vector<3x128xf32> -> vector<3x128xf32>
    %45 = vector.broadcast %13 : vector<3x1xf32> to vector<3x128xf32>
    %46 = arith.addf %44, %45 : vector<3x128xf32>
    %c0_23 = arith.constant 0 : index
    %c0_24 = arith.constant 0 : index
    %c0_25 = arith.constant 0 : index
    %47 = vector.load %arg10[%c0_23, %c0_24, %c0_25] : memref<2x3x128xf32, #tpu.memory_space<vmem>>, vector<1x3x128xf32>
    %48 = vector.shape_cast %47 : vector<1x3x128xf32> to vector<3x128xf32>
    %49 = vector.shape_cast %46 : vector<3x128xf32> to vector<1x3x128xf32>
    tpu.vector_store %arg10[%c0_23, %c0_24, %c0_25], %49 {strides = array<i32>} : memref<2x3x128xf32, #tpu.memory_space<vmem>>, vector<1x3x128xf32>,
    %c1 = arith.constant 1 : index
    %c0_26 = arith.constant 0 : index
    %c0_27 = arith.constant 0 : index
    %50 = vector.load %arg3[%c1, %c0_26, %c0_27] : memref<2x128x1xf32, #tpu.memory_space<vmem>>, vector<1x128x1xf32>
    %51 = vector.shape_cast %50 : vector<1x128x1xf32> to vector<128x1xf32>
    %52 = vector.extract_strided_slice %51 {offsets = [0, 0], sizes = [64, 1], strides = [1, 1]} : vector<128x1xf32> to vector<64x1xf32>
    %53 = vector.extract_strided_slice %51 {offsets = [64, 0], sizes = [64, 1], strides = [1, 1]} : vector<128x1xf32> to vector<64x1xf32>
    %54 = vector.broadcast %4 : vector<64x1xf32> to vector<64x128xf32>
    %55 = vector.broadcast %1 : vector<1x128xf32> to vector<64x128xf32>
    %56 = arith.mulf %54, %55 : vector<64x128xf32>
    %57 = vector.broadcast %5 : vector<64x1xf32> to vector<64x128xf32>
    %58 = vector.broadcast %2 : vector<1x128xf32> to vector<64x128xf32>
    %59 = arith.mulf %57, %58 : vector<64x128xf32>
    %60 = arith.addf %56, %59 : vector<64x128xf32>
    %61 = vector.broadcast %52 : vector<64x1xf32> to vector<64x128xf32>
    %62 = arith.addf %60, %61 : vector<64x128xf32>
    %cst_28 = arith.constant 0.000000e+00 : f32
    %63 = vector.broadcast %cst_28 : f32 to vector<64x128xf32>
    %64 = arith.maximumf %62, %63 : vector<64x128xf32>
    %cst_29 = arith.constant dense<0.000000e+00> : vector<32x128xf32>
    %65 = tpu.matmul %6, %64, %cst_29 {dimension_numbers = #tpu.dot_dimension_numbers<[1], [0], [0], [1], [0, 0, 1, 1], [], []>} : vector<32x64xf32>, vector<64x128xf32>, vector<32x128xf32> -> vector<32x128xf32>
    %66 = vector.broadcast %11 : vector<32x1xf32> to vector<32x128xf32>
    %67 = arith.addf %65, %66 : vector<32x128xf32>
    %cst_30 = arith.constant 0.000000e+00 : f32
    %68 = vector.broadcast %cst_30 : f32 to vector<32x128xf32>
    %69 = arith.maximumf %67, %68 : vector<32x128xf32>
    %cst_31 = arith.constant dense<0.000000e+00> : vector<64x128xf32>
    %70 = tpu.matmul %7, %69, %cst_31 {dimension_numbers = #tpu.dot_dimension_numbers<[1], [0], [0], [1], [0, 0, 1, 1], [], []>} : vector<64x32xf32>, vector<32x128xf32>, vector<64x128xf32> -> vector<64x128xf32>
    %71 = vector.broadcast %53 : vector<64x1xf32> to vector<64x128xf32>
    %72 = arith.addf %70, %71 : vector<64x128xf32>
    %cst_32 = arith.constant 0.000000e+00 : f32
    %73 = vector.broadcast %cst_32 : f32 to vector<64x128xf32>
    %74 = arith.maximumf %72, %73 : vector<64x128xf32>
    %cst_33 = arith.constant dense<0.000000e+00> : vector<32x128xf32>
    %75 = tpu.matmul %8, %74, %cst_33 {dimension_numbers = #tpu.dot_dimension_numbers<[1], [0], [0], [1], [0, 0, 1, 1], [], []>} : vector<32x64xf32>, vector<64x128xf32>, vector<32x128xf32> -> vector<32x128xf32>
    %76 = vector.broadcast %12 : vector<32x1xf32> to vector<32x128xf32>
    %77 = arith.addf %75, %76 : vector<32x128xf32>
    %cst_34 = arith.constant 0.000000e+00 : f32
    %78 = vector.broadcast %cst_34 : f32 to vector<32x128xf32>
    %79 = arith.maximumf %77, %78 : vector<32x128xf32>
    %cst_35 = arith.constant dense<0.000000e+00> : vector<3x128xf32>
    %80 = tpu.matmul %9, %79, %cst_35 {dimension_numbers = #tpu.dot_dimension_numbers<[1], [0], [0], [1], [0, 0, 1, 1], [], []>} : vector<3x32xf32>, vector<32x128xf32>, vector<3x128xf32> -> vector<3x128xf32>
    %81 = vector.broadcast %13 : vector<3x1xf32> to vector<3x128xf32>
    %82 = arith.addf %80, %81 : vector<3x128xf32>
    %c1_36 = arith.constant 1 : index
    %c0_37 = arith.constant 0 : index
    %c0_38 = arith.constant 0 : index
    %83 = vector.load %arg10[%c1_36, %c0_37, %c0_38] : memref<2x3x128xf32, #tpu.memory_space<vmem>>, vector<1x3x128xf32>
    %84 = vector.shape_cast %83 : vector<1x3x128xf32> to vector<3x128xf32>
    %85 = vector.shape_cast %82 : vector<3x128xf32> to vector<1x3x128xf32>
    tpu.vector_store %arg10[%c1_36, %c0_37, %c0_38], %85 {strides = array<i32>} : memref<2x3x128xf32, #tpu.memory_space<vmem>>, vector<1x3x128xf32>,
    return
  }
  func.func @transform_0(%arg0: i32, %arg1: i32) -> (i32, i32) {
    %c0_i32 = arith.constant 0 : i32
    %c0_i32_0 = arith.constant 0 : i32
    return %c0_i32, %arg1 : i32, i32
  }
  func.func @transform_1(%arg0: i32, %arg1: i32) -> (i32, i32, i32) {
    %c0_i32 = arith.constant 0 : i32
    %c0_i32_0 = arith.constant 0 : i32
    %c0_i32_1 = arith.constant 0 : i32
    return %arg0, %c0_i32, %c0_i32_0 : i32, i32, i32
  }
  func.func @transform_2(%arg0: i32, %arg1: i32) -> (i32, i32) {
    %c0_i32 = arith.constant 0 : i32
    %c0_i32_0 = arith.constant 0 : i32
    %c0_i32_1 = arith.constant 0 : i32
    return %c0_i32, %c0_i32_0 : i32, i32
  }
  func.func @transform_3(%arg0: i32, %arg1: i32) -> (i32, i32) {
    %c0_i32 = arith.constant 0 : i32
    %c0_i32_0 = arith.constant 0 : i32
    %c0_i32_1 = arith.constant 0 : i32
    return %c0_i32, %c0_i32_0 : i32, i32
  }
  func.func @transform_4(%arg0: i32, %arg1: i32) -> (i32, i32) {
    %c0_i32 = arith.constant 0 : i32
    %c0_i32_0 = arith.constant 0 : i32
    %c0_i32_1 = arith.constant 0 : i32
    return %c0_i32, %c0_i32_0 : i32, i32
  }
  func.func @transform_5(%arg0: i32, %arg1: i32) -> (i32, i32) {
    %c0_i32 = arith.constant 0 : i32
    %c0_i32_0 = arith.constant 0 : i32
    %c0_i32_1 = arith.constant 0 : i32
    return %c0_i32, %c0_i32_0 : i32, i32
  }
  func.func @transform_6(%arg0: i32, %arg1: i32) -> (i32, i32) {
    %c0_i32 = arith.constant 0 : i32
    %c0_i32_0 = arith.constant 0 : i32
    %c0_i32_1 = arith.constant 0 : i32
    return %c0_i32, %c0_i32_0 : i32, i32
  }
  func.func @transform_7(%arg0: i32, %arg1: i32) -> (i32, i32) {
    %c0_i32 = arith.constant 0 : i32
    %c0_i32_0 = arith.constant 0 : i32
    %c0_i32_1 = arith.constant 0 : i32
    return %c0_i32, %c0_i32_0 : i32, i32
  }
  func.func @transform_8(%arg0: i32, %arg1: i32) -> (i32, i32, i32) {
    %c0_i32 = arith.constant 0 : i32
    %c0_i32_0 = arith.constant 0 : i32
    return %arg0, %c0_i32, %arg1 : i32, i32, i32
  }
}

</mosaic_0001>

<bundles_post_ra>
// kernel: tpu_custom_call.1
= control target key start
LH: loop header
LB: loop body
LE: loop exit
PB: predicated region body
PF: predicated region fallthrough
CT: control target
= control target key end

     0   :  { %v1518_v0 = vmov 1   ;;  %v1519_v1 = vmov 0   ;;  %vm260_vm0 = vcmask 523264   ;;  %v120_v54 = vlaneseq  ;;  %s1956_s2 = inlined_call_operand.vmem [shape: f32[64,2], index: 2, kind: input, shape index: {}]   ;;  %s1957_s1 = inlined_call_operand.vmem [shape: f32[2,128,1], index: 1, kind: input, shape index: {}]   ;;  %s1958_s7 = inlined_call_operand.vmem [shape: f32[67,1], index: 7, kind: input, shape index: {}]   ;;  %s1959_s3 = inlined_call_operand.vmem [shape: f32[32,64], index: 3, kind: input, shape index: {}]   ;;  %s1960_s0 = inlined_call_operand.vmem [shape: f32[2,128], index: 0, kind: input, shape index: {}]   ;;  %s1961_s4 = inlined_call_operand.vmem [shape: f32[64,32], index: 4, kind: input, shape index: {}]   ;;  %s1962_s5 = inlined_call_operand.vmem [shape: f32[32,64], index: 5, kind: input, shape index: {}]   ;;  %s1963_s6 = inlined_call_operand.vmem [shape: f32[3,32], index: 6, kind: input, shape index: {}]   ;;  %s1964_s8 = inlined_call_operand.vmem [shape: f32[2,3,128], index: 8, kind: output, shape index: {}]  }
   0x1   :  { %1507 = vset.pattern.permute.xlu0 %v1518_v0  ;;  %1508 = vset.pattern.permute.xlu1 %v1519_v1  ;;  %v37_v2 = vld [vmem:[%s1956_s2 + $0x38] sm:$0xff]  ;;  %v36_v3 = vld [vmem:[%s1956_s2 + $0x30] sm:$0xff]  ;;  %v35_v4 = vld [vmem:[%s1956_s2 + $0x28] sm:$0xff]  ;;  %vm402_vm1 = vcmask 261120   ;;  %vm1521_vm2 = vmmov 0  }
   0x2   :  { %161 = vperm.xlu0 %1507, %v37_v2   ;;  %112 = vperm.xlu1 %1508, %v36_v3   ;;  %v32_v5 = vld [vmem:[%s1956_s2 + $0x10] sm:$0xff]  ;;  %v31_v6 = vld [vmem:[%s1956_s2 + $0x8] sm:$0xff]  ;;  %v71_v7 = vld [vmem:[%s1957_s1 + $0x38] sm:$0xff]  ;;  %v121_v57 = vshrl.u32 %v120_v54, 7 }
   0x3   :  { %v34_v8 = vld [vmem:[%s1956_s2 + $0x20] sm:$0xff]  ;;  %v70_v9 = vld [vmem:[%s1957_s1 + $0x30] sm:$0xff]  ;;  %v33_v10 = vld [vmem:[%s1956_s2 + $0x18] sm:$0xff] }
   0x4   :  { %v69_v11 = vld [vmem:[%s1957_s1 + $0x28] sm:$0xff]  ;;  %v30_v12 = vld [vmem:[%s1956_s2] sm:$0xff]  ;;  %v58_v15 = vld [vmem:[%s1958_s7 + $0x18] sm:$0xff]  ;;  %v166_v59 = vsub.s32 1, %v121_v57  ;;  %v122_v61 = vsub.s32 0, %v121_v57 }
   0x5   :  { %v65_v13 = vld [vmem:[%s1957_s1 + $0x8] sm:$0xff]  ;;  %v68_v14 = vld [vmem:[%s1957_s1 + $0x20] sm:$0xff]  ;;  %v67_v17 = vld [vmem:[%s1957_s1 + $0x18] sm:$0xff] }
   0x6   :  { %1509 = vset.pattern.permute.xlu1 %v1518_v0  ;;  %153 = vperm.xlu0 %1507, %v35_v4   ;;  %v56_v16 = vld [vmem:[%s1958_s7 + $0x8] sm:$0xff]  ;;  %v79_v18 = vld [vmem:[%s1957_s1 + $0x78] sm:$0xff]  ;;  %v66_v20 = vld [vmem:[%s1957_s1 + $0x10] sm:$0xff] }
   0x7   :  { %157 = vperm.xlu1 %1509, %v36_v3   ;;  %v77_v19 = vld [vmem:[%s1957_s1 + $0x68] sm:$0xff]  ;;  %v75_v21 = vld [vmem:[%s1957_s1 + $0x58] sm:$0xff]  ;;  %v64_v22 = vld [vmem:[%s1957_s1] sm:$0xff] }
   0x8   :  { %v73_v23 = vld [vmem:[%s1957_s1 + $0x48] sm:$0xff]  ;;  %v1636_v24 = vld [vmem:[%s1959_s3] sm:$0xff]  ;;  %v57_v25 = vld [vmem:[%s1958_s7 + $0x10] sm:$0xff] }
   0x9   :  { %1369 = vmatprep.mubr.msk.f32.mxu0 %vm260_vm0, %v1636_v24  ;;  %v62_v26 = vld [vmem:[%s1958_s7 + $0x38] sm:$0xff]  ;;  %v55_v27 = vld [vmem:[%s1958_s7] sm:$0xff]  ;;  %v60_v28 = vld [vmem:[%s1958_s7 + $0x28] sm:$0xff] }
   0xa   :  { %141 = vperm.xlu0 %1507, %v32_v5   ;;  %v78_v29 = vld [vmem:[%s1957_s1 + $0x70] sm:$0xff]  ;;  %v1244_v30 = vld [vmem:[%s1957_s1 + $0xb8] sm:$0xff]  ;;  %v76_v31 = vld [vmem:[%s1957_s1 + $0x60] sm:$0xff] }
   0xb   :  { %1510 = vset.pattern.permute.xlu1 %v1519_v1  ;;  %v1242_v32 = vld [vmem:[%s1957_s1 + $0xa8] sm:$0xff]  ;;  %v74_v33 = vld [vmem:[%s1957_s1 + $0x50] sm:$0xff]  ;;  %v1240_v34 = vld [vmem:[%s1957_s1 + $0x98] sm:$0xff] }
   0xc   :  { %107 = vperm.xlu1 %1510, %v35_v4   ;;  %v72_v35 = vld [vmem:[%s1957_s1 + $0x40] sm:$0xff]  ;;  %v1238_v36 = vld [vmem:[%s1957_s1 + $0x88] sm:$0xff]  ;;  %v61_v37 = vld [vmem:[%s1958_s7 + $0x30] sm:$0xff] }
   0xd   :  { %v1252_v38 = vld [vmem:[%s1957_s1 + $0xf8] sm:$0xff]  ;;  %v59_v39 = vld [vmem:[%s1958_s7 + $0x20] sm:$0xff]  ;;  %v1250_v40 = vld [vmem:[%s1957_s1 + $0xe8] sm:$0xff] }
   0xe   :  { %137 = vperm.xlu0 %1507, %v31_v6   ;;  %v1243_v41 = vld [vmem:[%s1957_s1 + $0xb0] sm:$0xff]  ;;  %v1248_v42 = vld [vmem:[%s1957_s1 + $0xd8] sm:$0xff]  ;;  %v1241_v43 = vld [vmem:[%s1957_s1 + $0xa0] sm:$0xff] }
   0xf   :  { %v1246_v44 = vld [vmem:[%s1957_s1 + $0xc8] sm:$0xff]  ;;  %v1239_v45 = vld [vmem:[%s1957_s1 + $0x90] sm:$0xff]  ;;  %v63_v46 = vld [vmem:[%s1958_s7 + $0x40] sm:$0x7] }
  0x10   :  { %221 = vperm.xlu1 %1510, %v71_v7   ;;  %v1237_v47 = vld [vmem:[%s1957_s1 + $0x80] sm:$0xff]  ;;  %v1251_v48 = vld [vmem:[%s1957_s1 + $0xf0] sm:$0xff] }
  0x11   :  { %v1249_v49 = vld [vmem:[%s1957_s1 + $0xe0] sm:$0xff]  ;;  %v1247_v50 = vld [vmem:[%s1957_s1 + $0xd0] sm:$0xff] }
  0x12   :  { %1515 = vset.pattern.permute.xlu0 %v1519_v1  ;;  %v1245_v51 = vld [vmem:[%s1957_s1 + $0xc0] sm:$0xff] }
  0x13   :  { %117 = vperm.xlu0 %1515, %v37_v2   ;;  %v29_v63 = vld [vmem:[%s1960_s0] sm:$0x3] }
  0x14   :  { %1511 = vset.pattern.permute.xlu1 %v1518_v0  ;;  %v123_v2 = vrot.slane %v29_v63, %v122_v61  ;;  %v1756_v61 = vld [vmem:[%s1959_s3 + $0x10] sm:$0xff] }
  0x15   :  { %149 = vperm.xlu1 %1511, %v34_v8  }
  0x17   :  { %102 = vperm.xlu0 %1515, %v34_v8  }
  0x19   :  { %1512 = vset.pattern.permute.xlu1 %v1519_v1 }
  0x1a   :  { %216 = vperm.xlu1 %1512, %v70_v9  }
  0x1b   :  { %97 = vperm.xlu0 %1515, %v33_v10  }
  0x1e   :  { %1513 = vset.pattern.permute.xlu1 %v1518_v0 }
  0x1f   :  { %145 = vperm.xlu1 %1513, %v33_v10   ;;  %211 = vperm.xlu0 %1515, %v69_v11  }
  0x23   :  { %1514 = vset.pattern.permute.xlu1 %v1519_v1  ;;  %82 = vperm.xlu0 %1515, %v30_v12  }
  0x24   :  { %92 = vperm.xlu1 %1514, %v32_v5  }
  0x27   :  { %191 = vperm.xlu0 %1515, %v65_v13  }
  0x28   :  { %206 = vperm.xlu1 %1514, %v68_v14  }
  0x2b   :  { %257 = vperm.xlu0 %1515, %v58_v15  }
  0x2c   :  { %87 = vperm.xlu1 %1514, %v31_v6  }
  0x2f   :  { %247 = vperm.xlu0 %1515, %v56_v16  }
  0x30   :  { %201 = vperm.xlu1 %1514, %v67_v17  }
  0x33   :  { %399 = vperm.xlu0 %1515, %v79_v18  }
  0x34   :  { %1516 = vset.pattern.permute.xlu1 %v1518_v0  ;;  %v167_v0 = vrot.slane %v29_v63, %v166_v59  ;;  %v1772_v63 = vld [vmem:[%s1961_s4] sm:$0xff] }
  0x35   :  { %133 = vperm.xlu1 %1516, %v30_v12   ;;  %1383 = vmatprep.mubr.msk.f32.mxu1 %vm402_vm1, %v1772_v63 }
  0x37   :  { %389 = vperm.xlu0 %1515, %v77_v19  }
  0x39   :  { %1517 = vset.pattern.permute.xlu1 %v1519_v1 }
  0x3a   :  { %196 = vperm.xlu1 %1517, %v66_v20  }
  0x3b   :  { %379 = vperm.xlu0 %1515, %v75_v21  }
  0x3e   :  { %186 = vperm.xlu1 %1517, %v64_v22  }
  0x3f   :  { %369 = vperm.xlu0 %1515, %v73_v23  }
  0x42   :  { %252 = vperm.xlu1 %1517, %v57_v25  }
  0x43   :  { %557 = vperm.xlu0 %1515, %v62_v26  }
  0x46   :  { %242 = vperm.xlu1 %1517, %v55_v27  }
  0x47   :  { %547 = vperm.xlu0 %1515, %v60_v28  }
  0x4a   :  { %394 = vperm.xlu1 %1517, %v78_v29  }
  0x4b   :  { %794 = vperm.xlu0 %1515, %v1244_v30  }
  0x4e   :  { %384 = vperm.xlu1 %1517, %v76_v31  }
  0x4f   :  { %784 = vperm.xlu0 %1515, %v1242_v32  }
  0x52   :  { %374 = vperm.xlu1 %1517, %v74_v33  }
  0x53   :  { %774 = vperm.xlu0 %1515, %v1240_v34  }
  0x56   :  { %364 = vperm.xlu1 %1517, %v72_v35  }
  0x57   :  { %764 = vperm.xlu0 %1515, %v1238_v36  }
  0x5a   :  { %552 = vperm.xlu1 %1517, %v61_v37  }
  0x5b   :  { %939 = vperm.xlu0 %1515, %v1252_v38  }
  0x5e   :  { %542 = vperm.xlu1 %1517, %v59_v39  }
  0x5f   :  { %929 = vperm.xlu0 %1515, %v1250_v40  }
  0x62   :  { %789 = vperm.xlu1 %1517, %v1243_v41  }
  0x63   :  { %919 = vperm.xlu0 %1515, %v1248_v42  }
  0x66   :  { %779 = vperm.xlu1 %1517, %v1241_v43  }
  0x67   :  { %909 = vperm.xlu0 %1515, %v1246_v44  }
  0x6a   :  { %769 = vperm.xlu1 %1517, %v1239_v45  }
  0x6b   :  { %663 = vperm.xlu0 %1515, %v63_v46  }
  0x6e   :  { %759 = vperm.xlu1 %1517, %v1237_v47  }
  0x72   :  { %934 = vperm.xlu1 %1517, %v1251_v48  }
  0x76   :  { %924 = vperm.xlu1 %1517, %v1249_v49  }
  0x7a   :  { %914 = vperm.xlu1 %1517, %v1247_v50  }
  0x7d   :  { %v113_v52 = vpop.permute.xlu1 %112  ;;  %v162_v53 = vpop.permute.xlu0 %161 }
  0x7e   :  { %904 = vperm.xlu1 %1517, %v1245_v51   ;;  %v175_v3 = vmul.f32 %v167_v0, %v162_v53  ;;  %v130_v9 = vmul.f32 %v123_v2, %v113_v52 }
  0x81   :  { %v154_v55 = vpop.permute.xlu0 %153 }
  0x82   :  { %v158_v56 = vpop.permute.xlu1 %157  ;;  %v173_v13 = vmul.f32 %v167_v0, %v154_v55 }
  0x83   :  { %v174_v6 = vmul.f32 %v167_v0, %v158_v56 }
  0x85   :  { %v142_v58 = vpop.permute.xlu0 %141  ;;  %v1727_v12 = vadd.f32 %v174_v6, %v130_v9 }
  0x86   :  { %v170_v45 = vmul.f32 %v167_v0, %v142_v58 }
  0x87   :  { %v108_v60 = vpop.permute.xlu1 %107 }
  0x88   :  { %v129_v14 = vmul.f32 %v123_v2, %v108_v60  ;;  %v1751_v60 = vld [vmem:[%s1959_s3 + $0x8] sm:$0xff] }
  0x89   :  { %v138_v62 = vpop.permute.xlu0 %137 }
  0x8a   :  { %v1730_v20 = vadd.f32 %v173_v13, %v129_v14  ;;  %v169_v42 = vmul.f32 %v167_v0, %v138_v62  ;;  %v1765_v62 = vld [vmem:[%s1959_s3 + $0x18] sm:$0xff] }
  0x8b   :  { %v222_v1 = vpop.permute.xlu1 %221 }
  0x8e   :  { %v118_v4 = vpop.permute.xlu0 %117 }
  0x8f   :  { %v131_v5 = vmul.f32 %v123_v2, %v118_v4 }
  0x90   :  { %v150_v7 = vpop.permute.xlu1 %149 }
  0x91   :  { %v1724_v8 = vadd.f32 %v175_v3, %v131_v5  ;;  %v172_v28 = vmul.f32 %v167_v0, %v150_v7 }
  0x92   :  { %v103_v10 = vpop.permute.xlu0 %102 }
  0x93   :  { %v231_v11 = vadd.f32 %v222_v1, %v1724_v8  ;;  %v128_v26 = vmul.f32 %v123_v2, %v103_v10 }
  0x95   :  { %v217_v15 = vpop.permute.xlu1 %216  ;;  %v239_v16 = vmax.f32 %v231_v11, 0.0  ;;  %v1733_v29 = vadd.f32 %v172_v28, %v128_v26  ;;  %v1833_v26 = vld [vmem:[%s1961_s4 + $0x38] sm:$0xff] }
  0x96   :  { %v230_v17 = vadd.f32 %v217_v15, %v1727_v12  ;;  %v98_v18 = vpop.permute.xlu0 %97 }
  0x97   :  { %1353 = vmatprep.subr.mxu0 %v239_v16  ;;  %v127_v32 = vmul.f32 %v123_v2, %v98_v18  ;;  %v1791_v18 = vld [vmem:[%s1961_s4 + $0x8] sm:$0xff] }
  0x98   :  { %v238_v19 = vmax.f32 %v230_v17, 0.0  ;;  %1354 = vmatpush3.msra.mxu0 %v239_v16 }
  0x9a   :  { %v146_v21 = vpop.permute.xlu1 %145  ;;  %v212_v22 = vpop.permute.xlu0 %211  ;;  %1355 = vmatprep.subr.mxu0 %v238_v19 }
  0x9b   :  { %v229_v23 = vadd.f32 %v212_v22, %v1730_v20  ;;  %1356 = vmatpush3.msra.mxu0 %v238_v19  ;;  %v171_v33 = vmul.f32 %v167_v0, %v146_v21  ;;  %v1796_v19 = vld [vmem:[%s1961_s4 + $0x10] sm:$0xff]  ;;  %v1805_v21 = vld [vmem:[%s1961_s4 + $0x18] sm:$0xff]  ;;  %v1810_v22 = vld [vmem:[%s1961_s4 + $0x20] sm:$0xff] }
  0x9d   :  { %v237_v25 = vmax.f32 %v229_v23, 0.0  ;;  %v1736_v36 = vadd.f32 %v171_v33, %v127_v32  ;;  %v1819_v23 = vld [vmem:[%s1961_s4 + $0x28] sm:$0xff] }
  0x9e   :  { %v83_v41 = vpop.permute.xlu0 %82 }
  0x9f   :  { %v93_v27 = vpop.permute.xlu1 %92  ;;  %1357 = vmatprep.subr.mxu0 %v237_v25  ;;  %v124_v51 = vmul.f32 %v123_v2, %v83_v41 }
  0xa0   :  { %1358 = vmatpush3.msra.mxu0 %v237_v25  ;;  %v126_v43 = vmul.f32 %v123_v2, %v93_v27  ;;  %v1824_v25 = vld [vmem:[%s1961_s4 + $0x30] sm:$0xff]  ;;  %v1840_v27 = vld [vmem:[%s1962_s5] sm:$0xff] }
  0xa2   :  { %v1741_v48 = vadd.f32 %v170_v45, %v126_v43  ;;  %v192_v49 = vpop.permute.xlu0 %191 }
  0xa3   :  { %v207_v30 = vpop.permute.xlu1 %206 }
  0xa4   :  { %v228_v31 = vadd.f32 %v207_v30, %v1733_v29 }
  0xa6   :  { %v236_v34 = vmax.f32 %v228_v31, 0.0 }
  0xa7   :  { %v88_v35 = vpop.permute.xlu1 %87 }
  0xa8   :  { %1359 = vmatprep.subr.mxu0 %v236_v34  ;;  %v125_v39 = vmul.f32 %v123_v2, %v88_v35 }
  0xa9   :  { %1360 = vmatpush3.msra.mxu0 %v236_v34 }
  0xaa   :  { %v1739_v46 = vadd.f32 %v169_v42, %v125_v39 }
  0xab   :  { %v202_v37 = vpop.permute.xlu1 %201 }
  0xac   :  { %v227_v38 = vadd.f32 %v202_v37, %v1736_v36  ;;  %v225_v53 = vadd.f32 %v192_v49, %v1739_v46 }
  0xae   :  { %v235_v40 = vmax.f32 %v227_v38, 0.0  ;;  %v233_v58 = vmax.f32 %v225_v53, 0.0 }
  0xb0   :  { %v134_v44 = vpop.permute.xlu1 %133  ;;  %1361 = vmatprep.subr.mxu0 %v235_v40 }
  0xb1   :  { %1362 = vmatpush3.msra.mxu0 %v235_v40  ;;  %v168_v47 = vmul.f32 %v167_v0, %v134_v44  ;;  %v1776_v0 = vpop.permute.xlu0 %257 }
  0xb3   :  { %v1745_v55 = vadd.f32 %v168_v47, %v124_v51 }
  0xb5   :  { %v197_v50 = vpop.permute.xlu1 %196  ;;  %v1781_v6 = vpop.permute.xlu0 %247 }
  0xb6   :  { %v226_v52 = vadd.f32 %v197_v50, %v1741_v48 }
  0xb8   :  { %v234_v54 = vmax.f32 %v226_v52, 0.0 }
  0xb9   :  { %v187_v56 = vpop.permute.xlu1 %186  ;;  %v400_v31 = vpop.permute.xlu0 %399 }
  0xba   :  { %v224_v57 = vadd.f32 %v187_v56, %v1745_v55  ;;  %1363 = vmatprep.subr.mxu0 %v234_v54 }
  0xbb   :  { %1364 = vmatpush3.msra.mxu0 %v234_v54 }
  0xbc   :  { %v232_v59 = vmax.f32 %v224_v57, 0.0  ;;  %1365 = vmatprep.subr.mxu0 %v233_v58 }
  0xbd   :  { %1366 = vmatpush3.msra.mxu0 %v233_v58  ;;  %v1778_v2 = vpop.permute.xlu1 %252  ;;  %v390_v37 = vpop.permute.xlu0 %389 }
  0xbe   :  { %1367 = vmatprep.subr.mxu0 %v232_v59 }
  0xbf   :  { %1368 = vmatpush3.msra.mxu0 %v232_v59 }
  0xc0   :  { %1370 = vmatmul.mubr.msk.f32.vlgmr.msra.gmra.mxu0 %vm260_vm0, %v1751_v60 }
  0xc1   :  { %1372 = vmatprep.mubr.msk.f32.mxu0 %vm260_vm0, %v1756_v61  ;;  %v1785_v13 = vpop.permute.xlu1 %242  ;;  %v380_v47 = vpop.permute.xlu0 %379 }
  0xc4   :  { %1373 = vmatmul.mubr.msk.f32.gmra.mxu0 %vm260_vm0, %v1765_v62 }
  0xc5   :  { %v395_v33 = vpop.permute.xlu1 %394  ;;  %v370_v57 = vpop.permute.xlu0 %369 }
  0xc9   :  { %v385_v39 = vpop.permute.xlu1 %384 }
  0xcd   :  { %v375_v51 = vpop.permute.xlu1 %374 }
 0x180   :  { %v1371_v1 = vpop.f32.mrf.mxu0 }
 0x181   :  { %v345_v9 = vadd.f32 %v1371_v1, %v1781_v6  ;;  %v365_v1 = vpop.permute.xlu1 %364 }
 0x182   :  { %v339_v3 = vpop.f32.mrf.mxu0 }
 0x183   :  { %v340_v14 = vadd.f32 %v339_v3, %v1785_v13  ;;  %v359_v16 = vmax.f32 %v345_v9, 0.0  ;;  %v1847_v9 = vld [vmem:[%s1962_s5 + $0x8] sm:$0xff] }
 0x184   :  { %v1374_v4 = vpop.f32.mrf.mxu0 }
 0x185   :  { %v355_v5 = vadd.f32 %v1374_v4, %v1776_v0  ;;  %v358_v17 = vmax.f32 %v340_v14, 0.0  ;;  %v1520_v14 = vmov 0.0  }
 0x186   :  { %v349_v7 = vpop.f32.mrf.mxu0  ;;  %1417 = vmatprep.subr.mxu0 %v1520_v14  ;;  %1425 = vmatprep.mubr.msk.f32.mxu0 %vm1521_vm2, %v1520_v14 }
 0x187   :  { %v361_v10 = vmax.f32 %v355_v5, 0.0  ;;  %v350_v11 = vadd.f32 %v349_v7, %v1778_v2 }
 0x189   :  { %v360_v15 = vmax.f32 %v350_v11, 0.0  ;;  %1375 = vmatprep.subr.mxu1 %v361_v10  ;;  %v1861_v11 = vld [vmem:[%s1962_s5 + $0x18] sm:$0xff] }
 0x18a   :  { %1376 = vmatpush3.msra.mxu1 %v361_v10  ;;  %v1852_v10 = vld [vmem:[%s1962_s5 + $0x10] sm:$0xff] }
 0x18b   :  { %1377 = vmatprep.subr.mxu1 %v360_v15 }
 0x18c   :  { %1378 = vmatpush3.msra.mxu1 %v360_v15  ;;  %v1870_v15 = vpop.permute.xlu0 %557 }
 0x18d   :  { %1379 = vmatprep.subr.mxu1 %v359_v16 }
 0x18e   :  { %1380 = vmatpush3.msra.mxu1 %v359_v16  ;;  %v1872_v16 = vpop.permute.xlu1 %552 }
 0x18f   :  { %1381 = vmatprep.subr.mxu1 %v358_v17 }
 0x190   :  { %1382 = vmatpush3.msra.mxu1 %v358_v17  ;;  %v1874_v17 = vpop.permute.xlu0 %547 }
 0x191   :  { %1384 = vmatmul.mubr.msk.f32.vlgmr.msra.gmra.mxu1 %vm402_vm1, %v1791_v18 }
 0x192   :  { %1386 = vmatprep.mubr.msk.f32.mxu1 %vm402_vm1, %v1796_v19 }
 0x195   :  { %1387 = vmatmul.mubr.msk.f32.gmra.mxu1 %vm402_vm1, %v1805_v21 }
 0x196   :  { %1389 = vmatprep.mubr.msk.f32.mxu1 %vm402_vm1, %v1810_v22 }
 0x199   :  { %1390 = vmatmul.mubr.msk.f32.gmra.mxu1 %vm402_vm1, %v1819_v23 }
 0x19a   :  { %1392 = vmatprep.mubr.msk.f32.mxu1 %vm402_vm1, %v1824_v25 }
 0x19d   :  { %1393 = vmatmul.mubr.msk.f32.gmra.mxu1 %vm402_vm1, %v1833_v26 }
 0x19e   :  { %1411 = vmatprep.mubr.msk.f32.mxu1 %vm260_vm0, %v1840_v27 }
 0x251   :  { %v1385_v28 = vpop.f32.mrf.mxu1 }
 0x252   :  { %v499_v58 = vadd.f32 %v1385_v28, %v370_v57  ;;  %v1876_v28 = vpop.permute.xlu1 %542 }
 0x253   :  { %v493_v30 = vpop.f32.mrf.mxu1 }
 0x254   :  { %v494_v3 = vadd.f32 %v493_v30, %v365_v1  ;;  %v533_v5 = vmax.f32 %v499_v58, 0.0 }
 0x255   :  { %v1388_v32 = vpop.f32.mrf.mxu1 }
 0x256   :  { %v509_v52 = vadd.f32 %v1388_v32, %v380_v47  ;;  %v532_v7 = vmax.f32 %v494_v3, 0.0 }
 0x257   :  { %v503_v34 = vpop.f32.mrf.mxu1 }
 0x258   :  { %v504_v54 = vadd.f32 %v503_v34, %v375_v51  ;;  %v535_v59 = vmax.f32 %v509_v52, 0.0  ;;  %v1889_v51 = vld [vmem:[%s1963_s6] sm:$0x7] }
 0x259   :  { %v1391_v35 = vpop.f32.mrf.mxu1 }
 0x25a   :  { %v519_v43 = vadd.f32 %v1391_v35, %v390_v37  ;;  %v534_v4 = vmax.f32 %v504_v54, 0.0 }
 0x25b   :  { %v513_v38 = vpop.f32.mrf.mxu1 }
 0x25c   :  { %v514_v49 = vadd.f32 %v513_v38, %v385_v39  ;;  %v537_v53 = vmax.f32 %v519_v43, 0.0 }
 0x25d   :  { %v1394_v40 = vpop.f32.mrf.mxu1 }
 0x25e   :  { %v529_v41 = vadd.f32 %v1394_v40, %v400_v31  ;;  %v536_v56 = vmax.f32 %v514_v49, 0.0  ;;  %v795_v31 = vpop.permute.xlu0 %794 }
 0x25f   :  { %v523_v42 = vpop.f32.mrf.mxu1 }
 0x260   :  { %v539_v44 = vmax.f32 %v529_v41, 0.0  ;;  %v524_v45 = vadd.f32 %v523_v42, %v395_v33  ;;  %v790_v33 = vpop.permute.xlu1 %789 }
 0x261   :  { %v803_v47 = vadd.f32 %v790_v33, %v1727_v12 }
 0x262   :  { %v538_v50 = vmax.f32 %v524_v45, 0.0  ;;  %1395 = vmatprep.subr.mxu1 %v539_v44  ;;  %v785_v37 = vpop.permute.xlu0 %784 }
 0x263   :  { %1396 = vmatpush3.msra.mxu1 %v539_v44  ;;  %v804_v44 = vadd.f32 %v795_v31, %v1724_v8  ;;  %v811_v54 = vmax.f32 %v803_v47, 0.0 }
 0x264   :  { %1397 = vmatprep.subr.mxu1 %v538_v50  ;;  %v780_v41 = vpop.permute.xlu1 %779 }
 0x265   :  { %1398 = vmatpush3.msra.mxu1 %v538_v50  ;;  %v812_v52 = vmax.f32 %v804_v44, 0.0  ;;  %v801_v12 = vadd.f32 %v780_v41, %v1733_v29 }
 0x266   :  { %1399 = vmatprep.subr.mxu1 %v537_v53  ;;  %v775_v49 = vpop.permute.xlu0 %774 }
 0x267   :  { %1400 = vmatpush3.msra.mxu1 %v537_v53  ;;  %v802_v53 = vadd.f32 %v785_v37, %v1730_v20  ;;  %v800_v57 = vadd.f32 %v775_v49, %v1736_v36  ;;  %v809_v58 = vmax.f32 %v801_v12, 0.0 }
 0x268   :  { %1401 = vmatprep.subr.mxu1 %v536_v56  ;;  %v770_v8 = vpop.permute.xlu1 %769 }
 0x269   :  { %1402 = vmatpush3.msra.mxu1 %v536_v56  ;;  %v810_v56 = vmax.f32 %v802_v53, 0.0  ;;  %v808_v29 = vmax.f32 %v800_v57, 0.0 }
 0x26a   :  { %1403 = vmatprep.subr.mxu1 %v535_v59  ;;  %v765_v20 = vpop.permute.xlu0 %764 }
 0x26b   :  { %1404 = vmatpush3.msra.mxu1 %v535_v59  ;;  %v799_v59 = vadd.f32 %v770_v8, %v1741_v48  ;;  %v798_v3 = vadd.f32 %v765_v20, %v1739_v46 }
 0x26c   :  { %1405 = vmatprep.subr.mxu1 %v534_v4  ;;  %v760_v1 = vpop.permute.xlu1 %759 }
 0x26d   :  { %1406 = vmatpush3.msra.mxu1 %v534_v4  ;;  %v807_v4 = vmax.f32 %v799_v59, 0.0  ;;  %v806_v36 = vmax.f32 %v798_v3, 0.0 }
 0x26e   :  { %1407 = vmatprep.subr.mxu1 %v533_v5  ;;  %v940_v46 = vpop.permute.xlu0 %939 }
 0x26f   :  { %1408 = vmatpush3.msra.mxu1 %v533_v5 }
 0x270   :  { %1409 = vmatprep.subr.mxu1 %v532_v7 }
 0x271   :  { %1410 = vmatpush3.msra.mxu1 %v532_v7 }
 0x272   :  { %1412 = vmatmul.mubr.msk.f32.vlgmr.msra.gmra.mxu1 %vm260_vm0, %v1847_v9  ;;  %v930_v48 = vpop.permute.xlu0 %929 }
 0x273   :  { %1414 = vmatprep.mubr.msk.f32.mxu1 %vm260_vm0, %v1852_v10 }
 0x276   :  { %1415 = vmatmul.mubr.msk.f32.gmra.mxu1 %vm260_vm0, %v1861_v11 }
 0x277   :  { %1458 = vmatprep.mubr.msk.f32.mxu1 %vm402_vm1, %v1772_v63 }
 0x332   :  { %v1413_v30 = vpop.f32.mrf.mxu1 }
 0x333   :  { %v644_v38 = vadd.f32 %v1413_v30, %v1874_v17 }
 0x334   :  { %v638_v32 = vpop.f32.mrf.mxu1 }
 0x335   :  { %v639_v42 = vadd.f32 %v638_v32, %v1876_v28  ;;  %v658_v45 = vmax.f32 %v644_v38, 0.0 }
 0x336   :  { %v1416_v63 = vpop.f32.mrf.mxu1 }
 0x337   :  { %v654_v34 = vadd.f32 %v1416_v63, %v1870_v15  ;;  %v657_v50 = vmax.f32 %v639_v42, 0.0 }
 0x338   :  { %v648_v35 = vpop.f32.mrf.mxu1 }
 0x339   :  { %v660_v39 = vmax.f32 %v654_v34, 0.0  ;;  %v649_v40 = vadd.f32 %v648_v35, %v1872_v16 }
 0x33b   :  { %v659_v43 = vmax.f32 %v649_v40, 0.0  ;;  %1418 = vmatpush3.msra.mxu0 %v660_v39 }
 0x33c   :  { %1419 = vmatprep.subr.mxu0 %v1520_v14 }
 0x33d   :  { %1420 = vmatpush3.msra.mxu0 %v659_v43 }
 0x33e   :  { %1421 = vmatprep.subr.mxu0 %v1520_v14 }
 0x33f   :  { %1422 = vmatpush3.msra.mxu0 %v658_v45 }
 0x340   :  { %1423 = vmatprep.subr.mxu0 %v1520_v14 }
 0x341   :  { %1424 = vmatpush3.msra.mxu0 %v657_v50 }
 0x342   :  { %1426 = vmatmul.mubr.msk.f32.vlgmr.msra.gmra.mxu0 %vm402_vm1, %v1889_v51  ;;  %1428 = vmatprep.subr.mxu0 %v812_v52 }
 0x343   :  { %1429 = vmatpush3.msra.mxu0 %v812_v52  ;;  %1444 = vmatprep.mubr.msk.f32.mxu0 %vm260_vm0, %v1636_v24  ;;  %v797_v24 = vadd.f32 %v760_v1, %v1745_v55  ;;  %v920_v55 = vpop.permute.xlu0 %919 }
 0x344   :  { %1430 = vmatprep.subr.mxu0 %v811_v54 }
 0x345   :  { %1431 = vmatpush3.msra.mxu0 %v811_v54  ;;  %v805_v5 = vmax.f32 %v797_v24, 0.0 }
 0x346   :  { %1432 = vmatprep.subr.mxu0 %v810_v56 }
 0x347   :  { %1433 = vmatpush3.msra.mxu0 %v810_v56  ;;  %v910_v7 = vpop.permute.xlu0 %909 }
 0x348   :  { %1434 = vmatprep.subr.mxu0 %v809_v58 }
 0x349   :  { %1435 = vmatpush3.msra.mxu0 %v809_v58 }
 0x34a   :  { %1436 = vmatprep.subr.mxu0 %v808_v29 }
 0x34b   :  { %1437 = vmatpush3.msra.mxu0 %v808_v29  ;;  %v1911_v30 = vpop.permute.xlu0 %663 }
 0x34c   :  { %1438 = vmatprep.subr.mxu0 %v807_v4 }
 0x34d   :  { %1439 = vmatpush3.msra.mxu0 %v807_v4 }
 0x34e   :  { %1440 = vmatprep.subr.mxu0 %v806_v36 }
 0x34f   :  { %1441 = vmatpush3.msra.mxu0 %v806_v36 }
 0x350   :  { %1442 = vmatprep.subr.mxu0 %v805_v5 }
 0x351   :  { %1443 = vmatpush3.msra.mxu0 %v805_v5 }
 0x352   :  { %1445 = vmatmul.mubr.msk.f32.vlgmr.msra.gmra.mxu0 %vm260_vm0, %v1751_v60  ;;  %1492 = vmatprep.subr.mxu0 %v1520_v14 }
 0x353   :  { %1447 = vmatprep.mubr.msk.f32.mxu0 %vm260_vm0, %v1756_v61 }
 0x356   :  { %1448 = vmatmul.mubr.msk.f32.gmra.mxu0 %vm260_vm0, %v1765_v62 }
 0x357   :  { %1500 = vmatprep.mubr.msk.f32.mxu0 %vm1521_vm2, %v1520_v14 }
 0x402   :  { %v735_v31 = vpop.f32.mrf.mxu0 }
 0x403   :  { %v736_v60 = vadd.f32 %v735_v31, %v1911_v30 }
 0x404   :  { %v1427_v32 = vpop.f32.mrf.mxu0 }
 0x405   :  { %739 = vst [vmem:[%s1964_s8] sm:$0x7] %v736_v60 }
 0x412   :  { %v1446_v61 = vpop.f32.mrf.mxu0 }
 0x413   :  { %v885_v35 = vadd.f32 %v1446_v61, %v1781_v6 }
 0x414   :  { %v879_v33 = vpop.f32.mrf.mxu0 }
 0x415   :  { %v880_v39 = vadd.f32 %v879_v33, %v1785_v13  ;;  %v899_v41 = vmax.f32 %v885_v35, 0.0  ;;  %v935_v13 = vpop.permute.xlu1 %934 }
 0x416   :  { %v1449_v62 = vpop.f32.mrf.mxu0 }
 0x417   :  { %v895_v63 = vadd.f32 %v1449_v62, %v1776_v0  ;;  %v898_v42 = vmax.f32 %v880_v39, 0.0 }
 0x418   :  { %v889_v34 = vpop.f32.mrf.mxu0 }
 0x419   :  { %v901_v37 = vmax.f32 %v895_v63, 0.0  ;;  %v890_v38 = vadd.f32 %v889_v34, %v1778_v2 }
 0x41b   :  { %v900_v40 = vmax.f32 %v890_v38, 0.0  ;;  %1450 = vmatprep.subr.mxu1 %v901_v37 }
 0x41c   :  { %1451 = vmatpush3.msra.mxu1 %v901_v37 }
 0x41d   :  { %1452 = vmatprep.subr.mxu1 %v900_v40 }
 0x41e   :  { %1453 = vmatpush3.msra.mxu1 %v900_v40 }
 0x41f   :  { %1454 = vmatprep.subr.mxu1 %v899_v41 }
 0x420   :  { %1455 = vmatpush3.msra.mxu1 %v899_v41 }
 0x421   :  { %1456 = vmatprep.subr.mxu1 %v898_v42 }
 0x422   :  { %1457 = vmatpush3.msra.mxu1 %v898_v42 }
 0x423   :  { %1459 = vmatmul.mubr.msk.f32.vlgmr.msra.gmra.mxu1 %vm402_vm1, %v1791_v18 }
 0x424   :  { %1461 = vmatprep.mubr.msk.f32.mxu1 %vm402_vm1, %v1796_v19 }
 0x427   :  { %1462 = vmatmul.mubr.msk.f32.gmra.mxu1 %vm402_vm1, %v1805_v21 }
 0x428   :  { %1464 = vmatprep.mubr.msk.f32.mxu1 %vm402_vm1, %v1810_v22  ;;  %v925_v22 = vpop.permute.xlu1 %924 }
 0x42b   :  { %1465 = vmatmul.mubr.msk.f32.gmra.mxu1 %vm402_vm1, %v1819_v23 }
 0x42c   :  { %1467 = vmatprep.mubr.msk.f32.mxu1 %vm402_vm1, %v1824_v25 }
 0x42f   :  { %1468 = vmatmul.mubr.msk.f32.gmra.mxu1 %vm402_vm1, %v1833_v26  ;;  %v915_v26 = vpop.permute.xlu1 %914 }
 0x430   :  { %1486 = vmatprep.mubr.msk.f32.mxu1 %vm260_vm0, %v1840_v27 }
 0x433   :  { %v905_v56 = vpop.permute.xlu1 %904 }
 0x4e3   :  { %v1460_v0 = vpop.f32.mrf.mxu1 }
 0x4e4   :  { %v1014_v54 = vadd.f32 %v1460_v0, %v910_v7 }
 0x4e5   :  { %v1008_v2 = vpop.f32.mrf.mxu1 }
 0x4e6   :  { %v1009_v57 = vadd.f32 %v1008_v2, %v905_v56  ;;  %v1048_v58 = vmax.f32 %v1014_v54, 0.0 }
 0x4e7   :  { %v1463_v6 = vpop.f32.mrf.mxu1 }
 0x4e8   :  { %v1024_v27 = vadd.f32 %v1463_v6, %v920_v55  ;;  %v1047_v59 = vmax.f32 %v1009_v57, 0.0 }
 0x4e9   :  { %v1018_v18 = vpop.f32.mrf.mxu1 }
 0x4ea   :  { %v1019_v53 = vadd.f32 %v1018_v18, %v915_v26  ;;  %v1050_v12 = vmax.f32 %v1024_v27, 0.0 }
 0x4eb   :  { %v1466_v19 = vpop.f32.mrf.mxu1 }
 0x4ec   :  { %v1034_v45 = vadd.f32 %v1466_v19, %v930_v48  ;;  %v1049_v20 = vmax.f32 %v1019_v53, 0.0 }
 0x4ed   :  { %v1028_v21 = vpop.f32.mrf.mxu1 }
 0x4ee   :  { %v1029_v49 = vadd.f32 %v1028_v21, %v925_v22  ;;  %v1052_v52 = vmax.f32 %v1034_v45, 0.0 }
 0x4ef   :  { %v1469_v43 = vpop.f32.mrf.mxu1 }
 0x4f0   :  { %v1044_v44 = vadd.f32 %v1469_v43, %v940_v46  ;;  %v1051_v8 = vmax.f32 %v1029_v49, 0.0 }
 0x4f1   :  { %v1038_v23 = vpop.f32.mrf.mxu1 }
 0x4f2   :  { %v1054_v47 = vmax.f32 %v1044_v44, 0.0  ;;  %v1039_v25 = vadd.f32 %v1038_v23, %v935_v13 }
 0x4f4   :  { %v1053_v50 = vmax.f32 %v1039_v25, 0.0  ;;  %1470 = vmatprep.subr.mxu1 %v1054_v47 }
 0x4f5   :  { %1471 = vmatpush3.msra.mxu1 %v1054_v47 }
 0x4f6   :  { %1472 = vmatprep.subr.mxu1 %v1053_v50 }
 0x4f7   :  { %1473 = vmatpush3.msra.mxu1 %v1053_v50 }
 0x4f8   :  { %1474 = vmatprep.subr.mxu1 %v1052_v52 }
 0x4f9   :  { %1475 = vmatpush3.msra.mxu1 %v1052_v52 }
 0x4fa   :  { %1476 = vmatprep.subr.mxu1 %v1051_v8 }
 0x4fb   :  { %1477 = vmatpush3.msra.mxu1 %v1051_v8 }
 0x4fc   :  { %1478 = vmatprep.subr.mxu1 %v1050_v12 }
 0x4fd   :  { %1479 = vmatpush3.msra.mxu1 %v1050_v12 }
 0x4fe   :  { %1480 = vmatprep.subr.mxu1 %v1049_v20 }
 0x4ff   :  { %1481 = vmatpush3.msra.mxu1 %v1049_v20 }
 0x500   :  { %1482 = vmatprep.subr.mxu1 %v1048_v58 }
 0x501   :  { %1483 = vmatpush3.msra.mxu1 %v1048_v58 }
 0x502   :  { %1484 = vmatprep.subr.mxu1 %v1047_v59 }
 0x503   :  { %1485 = vmatpush3.msra.mxu1 %v1047_v59 }
 0x504   :  { %1487 = vmatmul.mubr.msk.f32.vlgmr.msra.gmra.mxu1 %vm260_vm0, %v1847_v9 }
 0x505   :  { %1489 = vmatprep.mubr.msk.f32.mxu1 %vm260_vm0, %v1852_v10 }
 0x508   :  { %1490 = vmatmul.mubr.msk.f32.gmra.mxu1 %vm260_vm0, %v1861_v11 }
 0x5c4   :  { %v1488_v1 = vpop.f32.mrf.mxu1 }
 0x5c5   :  { %v1127_v36 = vadd.f32 %v1488_v1, %v1874_v17 }
 0x5c6   :  { %v1121_v29 = vpop.f32.mrf.mxu1 }
 0x5c7   :  { %v1122_v48 = vadd.f32 %v1121_v29, %v1876_v28  ;;  %v1141_v10 = vmax.f32 %v1127_v36, 0.0 }
 0x5c8   :  { %v1491_v3 = vpop.f32.mrf.mxu1 }
 0x5c9   :  { %v1137_v4 = vadd.f32 %v1491_v3, %v1870_v15  ;;  %v1140_v11 = vmax.f32 %v1122_v48, 0.0 }
 0x5ca   :  { %v1131_v24 = vpop.f32.mrf.mxu1 }
 0x5cb   :  { %v1143_v5 = vmax.f32 %v1137_v4, 0.0  ;;  %v1132_v46 = vadd.f32 %v1131_v24, %v1872_v16 }
 0x5cd   :  { %v1142_v9 = vmax.f32 %v1132_v46, 0.0  ;;  %1493 = vmatpush3.msra.mxu0 %v1143_v5 }
 0x5ce   :  { %1494 = vmatprep.subr.mxu0 %v1520_v14 }
 0x5cf   :  { %1495 = vmatpush3.msra.mxu0 %v1142_v9 }
 0x5d0   :  { %1496 = vmatprep.subr.mxu0 %v1520_v14 }
 0x5d1   :  { %1497 = vmatpush3.msra.mxu0 %v1141_v10 }
 0x5d2   :  { %1498 = vmatprep.subr.mxu0 %v1520_v14 }
 0x5d3   :  { %1499 = vmatpush3.msra.mxu0 %v1140_v11 }
 0x5d4   :  { %1501 = vmatmul.mubr.msk.f32.vlgmr.msra.gmra.mxu0 %vm402_vm1, %v1889_v51 }
 0x694   :  { %v1210_v15 = vpop.f32.mrf.mxu0 }
 0x695   :  { %v1211_v16 = vadd.f32 %v1210_v15, %v1911_v30 }
 0x696   :  { %v1502_v17 = vpop.f32.mrf.mxu0 }
 0x697   :  { %1270 = vst [vmem:[%s1964_s8 + $0x4] sm:$0x7] %v1211_v16 }

</bundles_post_ra>
